<compile_context>
chip_gen: v5e
topology: v5e:2x2
jax: 0.10.0
libtpu: 0.0.40
codegen_flags: <defaults>
</compile_context>

<pallas_src>
import math

import jax
import jax.numpy as jnp
from jax.experimental import pallas as pl
from jax.experimental.pallas import tpu as pltpu


def _cdiv(a, b):
    return -(-a // b)


def _round_up(a, m):
    return _cdiv(a, m) * m


def _cross_network_kernel(x_ref, wg_ref, cw_ref, c_ref, exp_ref, o_ref):
    """One batch block of the closed-form cross network.

    x_ref  : (TB, Dp)        packed x0 block (P original rows per packed row)
    wg_ref : (Dp, L*P)       compact block-diagonal score weights (P==1 -> (D, L))
    cw_ref : (L,)   SMEM     per-layer scalars cw[l] = (sum_{j<l} b_j) . w_l
    c_ref  : (1, Dp)         final additive vector c_L = sum_l b_l (tiled per group)
    exp_ref: (P, Dp)         0/1 group->lane expansion matrix (unused when P == 1)
    o_ref  : (TB, Dp)        output block
    """
    n_layers = cw_ref.shape[0]
    p = wg_ref.shape[1] // n_layers            # packed groups per row (static)

    x0 = x_ref[...].astype(jnp.float32)        # (TB, Dp)

    # All per-layer / per-group scores with ONE compact MXU matmul: (TB, L*P).
    # L*P is small, so the score tile stays in vregs -- no VMEM round-trip and
    # no per-layer full-(TB, Dp) VPU passes.
    scores = jnp.dot(x0, wg_ref[...].astype(jnp.float32),
                     preferred_element_type=jnp.float32)

    # Tiny per-(row, group) scalar recurrence; n_layers is small & static -> unrolled.
    s = jnp.ones((x0.shape[0], p), dtype=jnp.float32)
    for l in range(n_layers):
        a_l = scores[:, l * p:(l + 1) * p]     # (TB, P)
        s = s * (1.0 + a_l) + cw_ref[l]        # cw scalar splat from SMEM (VPU)

    if p > 1:
        # Expand (TB, P) -> (TB, Dp) with one tiny 0/1 matmul (MXU, K = P).
        s = jnp.dot(s, exp_ref[...].astype(jnp.float32),
                    preferred_element_type=jnp.float32)
    # else: s is (TB, 1) and lane-broadcasts for free on the VPU.

    # Fused axpy; Dp is always a multiple of 128 -> lane-dense, unmasked stores.
    o_ref[...] = (x0 * s + c_ref[...]).astype(o_ref.dtype)


def cross_network(x, w, b, *, block_bytes=4 * 1024 * 1024, io_dtype=None):
    """CrossNetwork forward.

    x: (..., D) -- e.g. (batch, num_fields, embed_dim) as in the PyTorch module;
       the recurrence is independent per row, so leading dims are flattened.
    w: (L, D) stacked Linear(D, 1, bias=False) weights; b: (L, D) stacked biases.
    Returns an array with the same shape (and dtype) as x.

    block_bytes: HBM bytes per x0 batch block.  The default (~4 MiB) keeps the
    double-buffered in+out working set at ~16 MiB (safe under the 32 MiB scoped
    VMEM everywhere, incl. v7x's 64 MiB VMEM); on v5e/v6e (128 MiB VMEM) it can
    be raised -- the vmem limit below scales with it.
    io_dtype: optional streaming dtype (e.g. jnp.bfloat16) to halve HBM traffic
    for this memory-bound kernel; compute stays f32.  None = match x.dtype.
    """
    orig_shape = x.shape
    D = orig_shape[-1]
    x2 = x.reshape(-1, D)
    B = x2.shape[0]
    L = w.shape[0]
    f32 = jnp.float32

    stream_dtype = jnp.dtype(io_dtype) if io_dtype is not None else jnp.dtype(x.dtype)
    itemsize = stream_dtype.itemsize

    # ---- closed-form parameter preprocessing (tiny, O(L*D); folded by XLA) ----
    wf = w.astype(f32)
    bf = b.astype(f32)
    c_prev = jnp.cumsum(bf, axis=0) - bf            # c_l = sum_{j<l} b_j   (L, D)
    cw = jnp.sum(c_prev * wf, axis=1)               # cw[l] = c_l . w_l     (L,)
    c_fin = jnp.sum(bf, axis=0)                     # c_L                   (D,)

    # ---- lane packing: Dp = lcm(D, 128) so the lane axis is always dense ----
    P = 128 // math.gcd(D, 128)
    Dp = P * D

    if P > 1:
        eye_p = jnp.eye(P, dtype=f32)
        # Compact block-diagonal weights: wg[g*D + d, l*P + g'] = w[l, d] * delta(g, g')
        wg = jnp.einsum("ld,gh->gdlh", wf, eye_p).reshape(Dp, L * P)
        c_vec = jnp.tile(c_fin, P)[None, :]                       # (1, Dp)
        groups = jnp.arange(Dp) // D                              # lane -> group id
        expand = (groups[None, :] == jnp.arange(P)[:, None]).astype(f32)  # (P, Dp)
    else:
        wg = wf.T                                                 # (D, L)
        c_vec = c_fin[None, :]                                    # (1, D)
        expand = jnp.ones((1, Dp), dtype=f32)                     # unused in-kernel

    # ---- batch tiling: byte-budgeted tiles, but keep >= 4 blocks for megacore ----
    bp_needed = _cdiv(B, P)                         # packed rows needed
    target_grid = 4                                 # let v7x's 2 TCs split the batch
    tb_budget = max(8, (block_bytes // max(1, Dp * itemsize)) // 8 * 8)
    tb_split = max(8, _round_up(_cdiv(bp_needed, target_grid), 8))
    tb = max(8, min(tb_budget, tb_split, _round_up(bp_needed, 8)))
    grid_m = _cdiv(bp_needed, tb)
    bp = grid_m * tb
    b_padded = bp * P
    if b_padded != B:
        x2 = jnp.pad(x2, ((0, b_padded - B), (0, 0)))   # zero rows: sliced off below
    xp = x2.reshape(bp, Dp)                             # free, row-major view
    if io_dtype is not None:
        xp = xp.astype(stream_dtype)
    out_dtype = stream_dtype

    # ---- VMEM budget: 2x double-buffered (in + out) blocks + resident constants ----
    const_bytes = int(wg.size + c_vec.size + expand.size) * 4 + _round_up(L, 256) * 4
    vmem_need = 4 * tb * Dp * itemsize + 2 * const_bytes + (1 << 20)
    # Default block budget keeps this at 32 MiB (safe on v7x's 64 MiB VMEM); larger
    # budgets (sensible on v5e/v6e with 128 MiB VMEM) raise the limit accordingly.
    vmem_limit = int(min(max(32 << 20, vmem_need), 96 << 20))

    flops = (2 * bp * Dp * (L * P)            # score matmul
             + 3 * L * bp * P                 # s-recurrence
             + (2 * bp * P * Dp if P > 1 else 0)   # group->lane expand
             + 2 * bp * Dp)                   # fused axpy
    bytes_accessed = bp * Dp * itemsize * 2 + const_bytes

    out_p = pl.pallas_call(
        _cross_network_kernel,
        out_shape=jax.ShapeDtypeStruct((bp, Dp), out_dtype),
        grid=(grid_m,),
        in_specs=[
            pl.BlockSpec((tb, Dp), lambda i: (i, 0)),            # x0 block (pipelined)
            pl.BlockSpec(wg.shape, lambda i: (0, 0)),            # weights, VMEM-resident
            pl.BlockSpec(memory_space=pltpu.MemorySpace.SMEM),   # cw scalars
            pl.BlockSpec((1, Dp), lambda i: (0, 0)),             # c_L, VMEM-resident
            pl.BlockSpec(expand.shape, lambda i: (0, 0)),        # group->lane expand
        ],
        out_specs=pl.BlockSpec((tb, Dp), lambda i: (i, 0)),
        compiler_params=pltpu.CompilerParams(
            dimension_semantics=("parallel",),    # batch blocks split over v7x's 2 TCs
            vmem_limit_bytes=vmem_limit,
        ),
        cost_estimate=pl.CostEstimate(
            flops=flops, transcendentals=0, bytes_accessed=bytes_accessed),
    )(xp, wg, cw, c_vec, expand)

    out = out_p.reshape(b_padded, D)[:B].astype(x.dtype)
    return out.reshape(orig_shape)


def cross_network_ref(x, w, b):
    """Pure-JAX layer-by-layer reference matching the PyTorch forward exactly."""
    x0 = x
    out = x
    for i in range(w.shape[0]):
        xw = jnp.sum(out * w[i], axis=-1, keepdims=True)   # Linear(D, 1, bias=False)
        out = x0 * xw + b[i] + out
    return out


if __name__ == "__main__":
    key = jax.random.PRNGKey(0)
    ks = jax.random.split(key, 9)

    # Case 1: D < 128 -> lane-packed (P=4, Dp=128), multi-block batch-tiled grid.
    B1, D1, L1 = 512, 32, 3
    x1 = jax.random.normal(ks[0], (B1, D1), dtype=jnp.float32)
    bound1 = 1.0 / (D1 ** 0.5)
    w1 = jax.random.uniform(ks[1], (L1, D1), minval=-bound1, maxval=bound1, dtype=jnp.float32)
    b1 = 0.1 * jax.random.normal(ks[2], (L1, D1), dtype=jnp.float32)

    out1 = jax.block_until_ready(cross_network(x1, w1, b1))
    ref1 = cross_network_ref(x1, w1, b1)
    assert out1.shape == (B1, D1)
    assert jnp.allclose(out1, ref1, atol=1e-4, rtol=1e-4), \
        float(jnp.max(jnp.abs(out1 - ref1)))

    # Case 2: D >= 128 with D % 128 != 0 -> generalized packing (P=4, Dp=640) + pad.
    B2, D2, L2 = 50, 160, 2
    x2 = jax.random.normal(ks[3], (B2, D2), dtype=jnp.float32)
    bound2 = 1.0 / (D2 ** 0.5)
    w2 = jax.random.uniform(ks[4], (L2, D2), minval=-bound2, maxval=bound2, dtype=jnp.float32)
    b2 = 0.1 * jax.random.normal(ks[5], (L2, D2), dtype=jnp.float32)

    out2 = jax.block_until_ready(cross_network(x2, w2, b2))
    ref2 = cross_network_ref(x2, w2, b2)
    assert out2.shape == (B2, D2)
    assert jnp.allclose(out2, ref2, atol=1e-4, rtol=1e-4), \
        float(jnp.max(jnp.abs(out2 - ref2)))

    # Case 3: 3-D input (batch, num_fields, embed_dim) as in the module docstring,
    # with embed_dim=48 exercising the generalized packing (P=8, Dp=384).
    B3, F3, E3, L3 = 4, 6, 48, 2
    x3 = jax.random.normal(ks[6], (B3, F3, E3), dtype=jnp.float32)
    bound3 = 1.0 / (E3 ** 0.5)
    w3 = jax.random.uniform(ks[7], (L3, E3), minval=-bound3, maxval=bound3, dtype=jnp.float32)
    b3 = 0.1 * jax.random.normal(ks[8], (L3, E3), dtype=jnp.float32)

    out3 = jax.block_until_ready(cross_network(x3, w3, b3))
    ref3 = cross_network_ref(x3, w3, b3)
    assert out3.shape == (B3, F3, E3)
    assert jnp.allclose(out3, ref3, atol=1e-4, rtol=1e-4), \
        float(jnp.max(jnp.abs(out3 - ref3)))

    print("KERNEL_OK")
</pallas_src>

<mosaic_0001>
module attributes {stable_mosaic.version = 11 : i64} {
  func.func @_cross_network_kernel(%arg0: i32, %arg1: memref<32x128xf32, #tpu.memory_space<vmem>>, %arg2: memref<128x12xf32, #tpu.memory_space<vmem>>, %arg3: memref<3xf32, #tpu.memory_space<smem>>, %arg4: memref<1x128xf32, #tpu.memory_space<vmem>>, %arg5: memref<4x128xf32, #tpu.memory_space<vmem>>, %arg6: memref<32x128xf32, #tpu.memory_space<vmem>>) attributes {dimension_semantics = [#tpu.dimension_semantics<parallel>], iteration_bounds = array<i64: 4>, scalar_prefetch = 0 : i64, scratch_operands = 0 : i64, tpu.core_type = #tpu.core_type<tc>, window_params = [{transform_indices = @transform_0, window_bounds = array<i64: 32, 128>}, {pipeline_mode = #tpu.pipeline_mode<synchronous>, transform_indices = @transform_1, window_bounds = array<i64: 128, 12>}, {transform_indices = @transform_2, window_bounds = array<i64: 3>}, {pipeline_mode = #tpu.pipeline_mode<synchronous>, transform_indices = @transform_3, window_bounds = array<i64: 1, 128>}, {pipeline_mode = #tpu.pipeline_mode<synchronous>, transform_indices = @transform_4, window_bounds = array<i64: 4, 128>}, {transform_indices = @transform_5, window_bounds = array<i64: 32, 128>}]} {
    %c0 = arith.constant 0 : index
    %c0_0 = arith.constant 0 : index
    %0 = vector.load %arg1[%c0, %c0_0] : memref<32x128xf32, #tpu.memory_space<vmem>>, vector<32x128xf32>
    %c0_1 = arith.constant 0 : index
    %c0_2 = arith.constant 0 : index
    %1 = vector.load %arg2[%c0_1, %c0_2] : memref<128x12xf32, #tpu.memory_space<vmem>>, vector<128x12xf32>
    %cst = arith.constant dense<0.000000e+00> : vector<32x12xf32>
    %2 = tpu.matmul %0, %1, %cst {dimension_numbers = #tpu.dot_dimension_numbers<[1], [0], [0], [1], [0, 0, 1, 1], [], []>} : vector<32x128xf32>, vector<128x12xf32>, vector<32x12xf32> -> vector<32x12xf32>
    %cst_3 = arith.constant 1.000000e+00 : f32
    %3 = vector.broadcast %cst_3 : f32 to vector<32x4xf32>
    %4 = vector.extract_strided_slice %2 {offsets = [0, 0], sizes = [32, 4], strides = [1, 1]} : vector<32x12xf32> to vector<32x4xf32>
    %cst_4 = arith.constant 1.000000e+00 : f32
    %5 = vector.broadcast %cst_4 : f32 to vector<32x4xf32>
    %6 = arith.addf %5, %4 : vector<32x4xf32>
    %7 = arith.mulf %3, %6 : vector<32x4xf32>
    %c0_5 = arith.constant 0 : index
    %8 = memref.load %arg3[%c0_5] : memref<3xf32, #tpu.memory_space<smem>>
    %9 = vector.broadcast %8 : f32 to vector<32x4xf32>
    %10 = arith.addf %7, %9 : vector<32x4xf32>
    %11 = vector.extract_strided_slice %2 {offsets = [0, 4], sizes = [32, 4], strides = [1, 1]} : vector<32x12xf32> to vector<32x4xf32>
    %cst_6 = arith.constant 1.000000e+00 : f32
    %12 = vector.broadcast %cst_6 : f32 to vector<32x4xf32>
    %13 = arith.addf %12, %11 : vector<32x4xf32>
    %14 = arith.mulf %10, %13 : vector<32x4xf32>
    %c1 = arith.constant 1 : index
    %15 = memref.load %arg3[%c1] : memref<3xf32, #tpu.memory_space<smem>>
    %16 = vector.broadcast %15 : f32 to vector<32x4xf32>
    %17 = arith.addf %14, %16 : vector<32x4xf32>
    %18 = vector.extract_strided_slice %2 {offsets = [0, 8], sizes = [32, 4], strides = [1, 1]} : vector<32x12xf32> to vector<32x4xf32>
    %cst_7 = arith.constant 1.000000e+00 : f32
    %19 = vector.broadcast %cst_7 : f32 to vector<32x4xf32>
    %20 = arith.addf %19, %18 : vector<32x4xf32>
    %21 = arith.mulf %17, %20 : vector<32x4xf32>
    %c2 = arith.constant 2 : index
    %22 = memref.load %arg3[%c2] : memref<3xf32, #tpu.memory_space<smem>>
    %23 = vector.broadcast %22 : f32 to vector<32x4xf32>
    %24 = arith.addf %21, %23 : vector<32x4xf32>
    %c0_8 = arith.constant 0 : index
    %c0_9 = arith.constant 0 : index
    %25 = vector.load %arg5[%c0_8, %c0_9] : memref<4x128xf32, #tpu.memory_space<vmem>>, vector<4x128xf32>
    %cst_10 = arith.constant dense<0.000000e+00> : vector<32x128xf32>
    %26 = tpu.matmul %24, %25, %cst_10 {dimension_numbers = #tpu.dot_dimension_numbers<[1], [0], [0], [1], [0, 0, 1, 1], [], []>} : vector<32x4xf32>, vector<4x128xf32>, vector<32x128xf32> -> vector<32x128xf32>
    %27 = arith.mulf %0, %26 : vector<32x128xf32>
    %c0_11 = arith.constant 0 : index
    %c0_12 = arith.constant 0 : index
    %28 = vector.load %arg4[%c0_11, %c0_12] : memref<1x128xf32, #tpu.memory_space<vmem>>, vector<1x128xf32>
    %29 = vector.broadcast %28 : vector<1x128xf32> to vector<32x128xf32>
    %30 = arith.addf %27, %29 : vector<32x128xf32>
    %c0_13 = arith.constant 0 : index
    %c0_14 = arith.constant 0 : index
    %31 = vector.load %arg6[%c0_13, %c0_14] : memref<32x128xf32, #tpu.memory_space<vmem>>, vector<32x128xf32>
    tpu.vector_store %arg6[%c0_13, %c0_14], %30 {strides = array<i32>} : memref<32x128xf32, #tpu.memory_space<vmem>>, vector<32x128xf32>,
    return
  }
  func.func @transform_0(%arg0: i32) -> (i32, i32) {
    %c0_i32 = arith.constant 0 : i32
    %c0_i32_0 = arith.constant 0 : i32
    return %arg0, %c0_i32 : i32, i32
  }
  func.func @transform_1(%arg0: i32) -> (i32, i32) {
    %c0_i32 = arith.constant 0 : i32
    %c0_i32_0 = arith.constant 0 : i32
    %c0_i32_1 = arith.constant 0 : i32
    return %c0_i32, %c0_i32_0 : i32, i32
  }
  func.func @transform_2(%arg0: i32) -> i32 {
    %c0_i32 = arith.constant 0 : i32
    %c0_i32_0 = arith.constant 0 : i32
    return %c0_i32 : i32
  }
  func.func @transform_3(%arg0: i32) -> (i32, i32) {
    %c0_i32 = arith.constant 0 : i32
    %c0_i32_0 = arith.constant 0 : i32
    %c0_i32_1 = arith.constant 0 : i32
    return %c0_i32, %c0_i32_0 : i32, i32
  }
  func.func @transform_4(%arg0: i32) -> (i32, i32) {
    %c0_i32 = arith.constant 0 : i32
    %c0_i32_0 = arith.constant 0 : i32
    %c0_i32_1 = arith.constant 0 : i32
    return %c0_i32, %c0_i32_0 : i32, i32
  }
  func.func @transform_5(%arg0: i32) -> (i32, i32) {
    %c0_i32 = arith.constant 0 : i32
    %c0_i32_0 = arith.constant 0 : i32
    return %arg0, %c0_i32 : i32, i32
  }
}

</mosaic_0001>

<bundles_post_ra>
// kernel: tpu_custom_call.1
= control target key start
LH: loop header
LB: loop body
LE: loop exit
PB: predicated region body
PF: predicated region fallthrough
CT: control target
= control target key end

     0   :  { %10 = vsyncpa [#allocation4], 0  ;;  %s889_s0 = inlined_call_operand.vmem [shape: f32[128,128], index: 0, kind: input, shape index: {}]   ;;  %s890_s1 = inlined_call_operand.vmem [shape: f32[128,12], index: 1, kind: input, shape index: {}]   ;;  %s891_s2 = inlined_call_operand.vmem [shape: f32[3], index: 2, kind: input, shape index: {}]   ;;  %s892_s3 = inlined_call_operand.vmem [shape: f32[1,128], index: 3, kind: input, shape index: {}]   ;;  %s893_s4 = inlined_call_operand.vmem [shape: f32[4,128], index: 4, kind: input, shape index: {}]   ;;  %s894_s5 = inlined_call_operand.hbm [shape: f32[128,128], index: 5, kind: output, shape index: {}]  }
   0x1   :  { %11 = vsyncpa [#allocation3], 0 }
   0x2   :  { %13 = vsyncpa [#allocation3 + $0x1], 0  ;;  %s727_s18 = smov 0   ;;  %s729_s19 = smov 0  }
   0x3   :  { %s731_s20 = smov 0   ;;  %s733_s21 = smov 0  }
   0x4 LB: > { %s748_s22 = sadd.s32 4294967295, %s690_s21   ;;  %s500_s23 = sadd.s32 4294967294, %s690_s21   ;;  %s690_s21 = sphi %s733_s21, %s900_s21   ;;  %s686_s20 = sphi %s731_s20, %s899_s20   ;;  %s682_s19 = sphi %s729_s19, %s898_s19   ;;  %s678_s18 = sphi %s727_s18, %s897_s18  }
   0x5   : > { %s752_s24 = sadd.s32 1, %s690_s21   ;;  %s136_s25 = sadd.s32 1, %s686_s20 }
   0x6   : > { %s133_s26 = ssub.s32 %s690_s21, %s752_s24  ;;  %p146_p0 = scmp.ne.s32.totalorder %s686_s20, %s682_s19 }
   0x7   : > { %p134_p1 = scmp.eq.s32.totalorder %s133_s26, 0  ;;  %p147_p2 = scmp.eq.s32.totalorder %s748_s22, 3 }
   0x8   : > { %p152_p3 = scmp.ne.s32.totalorder %s682_s19, %s678_s18  ;;  %p153_p4 = scmp.eq.s32.totalorder %s500_s23, 3 }
   0x9   : > { %s763_s27 = scalar_select %p134_p1, %s686_s20, %s136_s25  }
   0xa   : > { %p765_p5 = por %p147_p2, %p146_p0  ;;  %p769_p6 = por %p153_p4, %p152_p3 }
   0xb   : > { %p501_p7 = scmp.ge.s32.totalorder %s690_s21, 1  ;;  %p160_p8 = scmp.lt.s32.totalorder %s690_s21, 5 }
   0xc   : > { %p568_p9 = scmp.eq.s32.totalorder %s748_s22, 0  ;;  %s175_s7 = sshll.u32 %s891_s2, 4  ;;  %s176_s7 = int_to_ptr.vmem [resolvable:$true] %s175_s7 }
   0xd   : > { %p161_p10 = pnand %p501_p7, %p160_p8  ;;  %s692_s8 = smov [#allocation2]  }
   0xf   : > { %p560_p11 = pneg %p161_p10  ;;  %203 = sbr.rel (%p161_p10) target bundleno = 468 (0x1d4), region = 40 }
  0x11   : > { %p561_p12 = pnand %p568_p9, %p560_p11 }
  0x13   : > { %563 = dma.vmem_to_smem (!%p561_p12), %s176_s7, 16, %s692_s8, [#allocation4]  }
  0x14   : > { %669 = dma.done.wait (%p568_p9), [#allocation4], 16  }
  0x15   : > { %671 = vsyncadd (%p568_p9), [#allocation4], 4294967280 }
  0x16   : > { %210 = sfence }
  0x17   : > { %v259_v0 = vld [vmem:[%s890_s1 + $0x78] sm:$0xff]  ;;  %v258_v1 = vld [vmem:[%s890_s1 + $0x70] sm:$0xff]  ;;  %v257_v2 = vld [vmem:[%s890_s1 + $0x68] sm:$0xff]  ;;  %s507_s9 = sshll.u32 %s748_s22, 2  ;;  %s693_s14 = smov 124   ;;  %vm361_vm0 = vcmask 1043456  }
  0x18   : > { %260 = vmatpush.msra.mxu0 %v259_v0  ;;  %522 = vmatpush.msra.mxu2 %v259_v0  ;;  %v256_v3 = vld [vmem:[%s890_s1 + $0x60] sm:$0xff]  ;;  %v255_v4 = vld [vmem:[%s890_s1 + $0x58] sm:$0xff]  ;;  %v254_v5 = vld [vmem:[%s890_s1 + $0x50] sm:$0xff]  ;;  %p234_p13 = scmp.lt.s32.totalorder %s507_s9, 15  ;;  %s694_s15 = smov 120   ;;  %vm348_vm1 = vcmask 31744  }
  0x19   : > { %523 = vmatpush.msra.mxu3 %v259_v0  ;;  %v253_v6 = vld [vmem:[%s890_s1 + $0x48] sm:$0xff]  ;;  %v252_v7 = vld [vmem:[%s890_s1 + $0x40] sm:$0xff]  ;;  %v251_v8 = vld [vmem:[%s890_s1 + $0x38] sm:$0xff]  ;;  %s293_s23 = sld [smem:[#allocation2]]  ;;  %s230_s30 = sand.u32 1, %s682_s19  }
  0x1a   : > { %261 = vmatpush.msra.mxu0 %v258_v1  ;;  %524 = vmatpush.msra.mxu2 %v258_v1  ;;  %v250_v9 = vld [vmem:[%s890_s1 + $0x30] sm:$0xff]  ;;  %v249_v10 = vld [vmem:[%s890_s1 + $0x28] sm:$0xff]  ;;  %s902_s9 = smov (!%p234_p13, %s507_s9), 15  ;;  %v248_v11 = vld [vmem:[%s890_s1 + $0x20] sm:$0xff]  ;;  %s509_s25 = sld [smem:[#allocation2 + $0x1]] }
  0x1b   : > { %525 = vmatpush.msra.mxu3 %v258_v1  ;;  %v247_v12 = vld [vmem:[%s890_s1 + $0x18] sm:$0xff]  ;;  %s508_s26 = sshll.u32 %s902_s9, 3  ;;  %v246_v13 = vld [vmem:[%s890_s1 + $0x10] sm:$0xff]  ;;  %v245_v14 = vld [vmem:[%s890_s1 + $0x8] sm:$0xff]  ;;  %s506_s6 = sshll.u32 %s230_s30, 5 }
  0x1c   : > { %262 = vmatpush.msra.mxu0 %v257_v2  ;;  %526 = vmatpush.msra.mxu2 %v257_v2  ;;  %s237_s12 = scalar_lea.vmem %s889_s0, %s508_s26  ;;  %v244_v15 = vld [vmem:[%s890_s1] sm:$0xff]  ;;  %s510_s26 = sld [smem:[#allocation2 + $0x2]] }
  0x1d   : > { %527 = vmatpush.msra.mxu3 %v257_v2  ;;  %v831_v16 = vld [vmem:[%s237_s12] sm:$0xff]  ;;  %v833_v17 = vld [vmem:[%s237_s12 + $0x8] sm:$0xff]  ;;  %v835_v18 = vld [vmem:[%s237_s12 + $0x10] sm:$0xff]  ;;  %s232_s10 = scalar_lea.vmem [#allocation5], %s506_s6  ;;  %s521_s11 = sshll.u32 %s748_s22, 5 }
  0x1e   : > { %263 = vmatpush.msra.mxu0 %v256_v3  ;;  %528 = vmatpush.msra.mxu2 %v256_v3  ;;  %v840_v19 = vld [vmem:[%s237_s12 + $0x18] sm:$0xff]  ;;  %v347_v28 = vld [vmem:[%s893_s4] sm:$0xf]  ;;  %s422_s13 = scalar_lea.hbm %s894_s5, %s521_s11  ;;  %s411_s16 = scalar_lea.sflag [#allocation3], %s230_s30 }
  0x1f   : > { %529 = vmatpush.msra.mxu3 %v256_v3  ;;  %511 = vmatpush.msk.msra.mxu1 %vm361_vm0, %v347_v28  ;;  %v294_v29 = vstv %s293_s23  ;;  %v608_v60 = vld [vmem:[%s892_s3] ss:$0 sm:$0xff] }
  0x20   : > { %264 = vmatpush.msra.mxu0 %v255_v4  ;;  %530 = vmatpush.msra.mxu2 %v255_v4  ;;  %v320_v33 = vstv %s509_s25 }
  0x21   : > { %531 = vmatpush.msra.mxu3 %v255_v4 }
  0x22   : > { %265 = vmatpush.msra.mxu0 %v254_v5  ;;  %532 = vmatpush.msra.mxu2 %v254_v5  ;;  %v342_v40 = vstv %s510_s26  ;;  %s644_s26 = scalar_lea.hbm %s894_s5, 128 }
  0x23   : > { %533 = vmatpush.msra.mxu3 %v254_v5 }
  0x24   : > { %266 = vmatpush.msra.mxu0 %v253_v6  ;;  %534 = vmatpush.msra.mxu2 %v253_v6 }
  0x25   : > { %535 = vmatpush.msra.mxu3 %v253_v6 }
  0x26   : > { %267 = vmatpush.msra.mxu0 %v252_v7  ;;  %536 = vmatpush.msra.mxu2 %v252_v7 }
  0x27   : > { %537 = vmatpush.msra.mxu3 %v252_v7 }
  0x28   : > { %268 = vmatpush.msra.mxu0 %v251_v8  ;;  %538 = vmatpush.msra.mxu2 %v251_v8 }
  0x29   : > { %539 = vmatpush.msra.mxu3 %v251_v8 }
  0x2a   : > { %269 = vmatpush.msra.mxu0 %v250_v9  ;;  %540 = vmatpush.msra.mxu2 %v250_v9 }
  0x2b   : > { %541 = vmatpush.msra.mxu3 %v250_v9 }
  0x2c   : > { %270 = vmatpush.msra.mxu0 %v249_v10  ;;  %542 = vmatpush.msra.mxu2 %v249_v10 }
  0x2d   : > { %543 = vmatpush.msra.mxu3 %v249_v10 }
  0x2e   : > { %271 = vmatpush.msra.mxu0 %v248_v11  ;;  %544 = vmatpush.msra.mxu2 %v248_v11 }
  0x2f   : > { %545 = vmatpush.msra.mxu3 %v248_v11 }
  0x30   : > { %272 = vmatpush.msra.mxu0 %v247_v12  ;;  %546 = vmatpush.msra.mxu2 %v247_v12 }
  0x31   : > { %547 = vmatpush.msra.mxu3 %v247_v12 }
  0x32   : > { %273 = vmatpush.msra.mxu0 %v246_v13  ;;  %548 = vmatpush.msra.mxu2 %v246_v13 }
  0x33   : > { %549 = vmatpush.msra.mxu3 %v246_v13 }
  0x34   : > { %274 = vmatpush.msra.mxu0 %v245_v14  ;;  %550 = vmatpush.msra.mxu2 %v245_v14 }
  0x35   : > { %551 = vmatpush.msra.mxu3 %v245_v14 }
  0x36   : > { %275 = vmatpush.msra.mxu0 %v244_v15  ;;  %552 = vmatpush.msra.mxu2 %v244_v15 }
  0x37   : > { %553 = vmatpush.msra.mxu3 %v244_v15  ;;  %276 = vmatmul.f32.vlgmr.msra.gmra.mxu0 %v831_v16 }
  0x38   : > { %279 = vmatmul.f32.vlgmr.msra.gmra.mxu2 %v833_v17  ;;  %282 = vmatmul.f32.vlgmr.msra.gmra.mxu3 %v835_v18 }
  0x40   : > { %285 = vmatmul.f32.gmra.mxu3 %v840_v19 }
  0xb4   : > { %v277_v20 = vpop.f32.mrf.mxu0 }
  0xb5   : > { %v289_v21 = vadd.f32 1.0, %v277_v20 }
  0xb7   : > { %303 = vrot.lane.b32.xlu0 %v289_v21, %s693_s14  ;;  %v295_v31 = vadd.f32 %v294_v29, %v289_v21 }
  0xbb   : > { %v280_v22 = vpop.f32.mrf.mxu2  ;;  %v283_v23 = vpop.f32.mrf.mxu3 }
  0xbc   : > { %v290_v24 = vadd.f32 1.0, %v280_v22  ;;  %v291_v25 = vadd.f32 1.0, %v283_v23 }
  0xbe   : > { %307 = vrot.lane.b32.xlu2 %v291_v25, %s693_s14  ;;  %305 = vrot.lane.b32.xlu1 %v290_v24, %s693_s14  ;;  %v296_v36 = vadd.f32 %v294_v29, %v290_v24  ;;  %v297_v44 = vadd.f32 %v294_v29, %v291_v25 }
  0xbf   : > { %325 = vrot.lane.b32.xlu0 %v289_v21, %s694_s15 }
  0xc3   : > { %v286_v26 = vpop.f32.mrf.mxu3 }
  0xc4   : > { %v292_v27 = vadd.f32 1.0, %v286_v26 }
  0xc6   : > { %329 = vrot.lane.b32.xlu2 %v291_v25, %s694_s15  ;;  %327 = vrot.lane.b32.xlu1 %v290_v24, %s694_s15  ;;  %v298_v53 = vadd.f32 %v294_v29, %v292_v27 }
  0xc7   : > { %309 = vrot.lane.b32.xlu0 %v292_v27, %s693_s14  ;;  %s423_s14 = sshll.u32 %s232_s10, 4  ;;  %s424_s14 = int_to_ptr.vmem [resolvable:$true] %s423_s14 }
  0xce   : > { %331 = vrot.lane.b32.xlu1 %v292_v27, %s694_s15  ;;  %s425_s15 = sshll.u32 %s422_s13, 4  ;;  %s426_s15 = int_to_ptr.hbm [resolvable:$true] %s425_s15 }
  0xcf   : > { %s638_s17 = sshra.s32 %s426_s15, 4  ;;  %s639_s17 = int_to_ptr.hbm [resolvable:$true] %s638_s17 }
  0xd0   : > { %s640_s22 = scalar_lea.hbm %s639_s17, 32  ;;  %p645_p3 = scmp.lt.s32.totalorder %s639_s17, %s894_s5 }
  0xd1   : > { %p641_p0 = scmp.ne.s32.totalorder %s639_s17, %s640_s22  ;;  %p646_p4 = scmp.lt.s32.totalorder %s644_s26, %s640_s22 }
  0xd3   : > { %p642_p1 = pnand %p641_p0, %p765_p5  ;;  %p647_p7 = por %p646_p4, %p645_p3 }
  0xd5   : > { %p643_p2 = pneg %p642_p1 }
  0xd7   : > { %p648_p8 = pnand %p647_p7, %p643_p2 }
 0x118   : > { %v308_v39 = vpop.permute.xlu2 %307 }
 0x119   : > { %v317_v47 = vmul.f32 %v308_v39, %v297_v44 }
 0x11b   : > { %v323_v50 = vadd.f32 %v320_v33, %v317_v47 }
 0x120   : > { %v330_v49 = vpop.permute.xlu2 %329 }
 0x121   : > { %v339_v52 = vmul.f32 %v330_v49, %v323_v50 }
 0x123   : > { %v345_v55 = vadd.f32 %v342_v40, %v339_v52 }
 0x129   : > { %v304_v30 = vpop.permute.xlu0 %303 }
 0x12a   : > { %v315_v32 = vmul.f32 %v304_v30, %v295_v31 }
 0x12c   : > { %v321_v35 = vadd.f32 %v320_v33, %v315_v32 }
 0x130   : > { %v306_v34 = vpop.permute.xlu1 %305 }
 0x131   : > { %v326_v37 = vpop.permute.xlu0 %325  ;;  %v316_v41 = vmul.f32 %v306_v34, %v296_v36 }
 0x132   : > { %v337_v38 = vmul.f32 %v326_v37, %v321_v35 }
 0x133   : > { %v322_v43 = vadd.f32 %v320_v33, %v316_v41 }
 0x134   : > { %v343_v42 = vadd.f32 %v342_v40, %v337_v38 }
 0x136   : > { %512 = vmatmul.msk.f32.vlgmr.msra.gmra.mxu1 %vm348_vm1, %v343_v42 }
 0x138   : > { %v328_v45 = vpop.permute.xlu1 %327 }
 0x139   : > { %v338_v46 = vmul.f32 %v328_v45, %v322_v43  ;;  %v310_v51 = vpop.permute.xlu0 %309 }
 0x13a   : > { %v318_v54 = vmul.f32 %v310_v51, %v298_v53 }
 0x13b   : > { %v344_v48 = vadd.f32 %v342_v40, %v338_v46 }
 0x13c   : > { %v324_v57 = vadd.f32 %v320_v33, %v318_v54 }
 0x13e   : > { %513 = vmatmul.msk.f32.gmra.mxu1 %vm348_vm1, %v344_v48 }
 0x140   : > { %v332_v56 = vpop.permute.xlu1 %331 }
 0x141   : > { %v340_v58 = vmul.f32 %v332_v56, %v324_v57 }
 0x143   : > { %v346_v59 = vadd.f32 %v342_v40, %v340_v58 }
 0x146   : > { %514 = vmatmul.msk.f32.gmra.mxu1 %vm348_vm1, %v345_v55 }
 0x14e   : > { %515 = vmatmul.msk.f32.gmra.mxu1 %vm348_vm1, %v346_v59 }
 0x1b3   : > { %v382_v61 = vpop.f32.mrf.mxu1 }
 0x1b4   : > { %v394_v62 = vmul.f32 %v382_v61, %v831_v16 }
 0x1b6   : > { %v402_v63 = vadd.f32 %v608_v60, %v394_v62 }
 0x1b8   : > { %406 = vst [vmem:[%s232_s10] sm:$0xff] %v402_v63 }
 0x1bb   : > { %v385_v0 = vpop.f32.mrf.mxu1 }
 0x1bc   : > { %v395_v1 = vmul.f32 %v385_v0, %v833_v17 }
 0x1be   : > { %v403_v2 = vadd.f32 %v608_v60, %v395_v1 }
 0x1c0   : > { %407 = vst [vmem:[%s232_s10 + $0x8] sm:$0xff] %v403_v2 }
 0x1c3   : > { %v388_v3 = vpop.f32.mrf.mxu1 }
 0x1c4   : > { %v396_v4 = vmul.f32 %v388_v3, %v835_v18 }
 0x1c6   : > { %v404_v5 = vadd.f32 %v608_v60, %v396_v4 }
 0x1c8   : > { %408 = vst [vmem:[%s232_s10 + $0x10] sm:$0xff] %v404_v5 }
 0x1cb   : > { %v391_v6 = vpop.f32.mrf.mxu1 }
 0x1cc   : > { %v397_v7 = vmul.f32 %v391_v6, %v840_v19 }
 0x1ce   : > { %v405_v8 = vadd.f32 %v608_v60, %v397_v7 }
 0x1d0   : > { %409 = vst [vmem:[%s232_s10 + $0x18] sm:$0xff] %v405_v8 }
 0x1d1   : > { %651 = shalt.err (!%p648_p8)
}
 0x1d2   : > { %s695_s30 = smov 128   ;;  %s696_s8 = smov 8  }
 0x1d3   : > { %558 = dma.vmem_to_hbm [thread:$0]  (%p765_p5), %s424_s14, 512, %s426_s15, %s411_s16, %s695_s30, %s695_s30, %s696_s8  }
 0x1d4 PF: > { %p570_p9 = scmp.ge.s32.totalorder %s690_s21, 2  ;;  %s440_s10 = sand.u32 1, %s678_s18  }
 0x1d5   : > { %s441_s11 = scalar_lea.sflag [#allocation3], %s440_s10 }
 0x1d6   : > { %p565_p10 = pnand %p570_p9, %p769_p6 }
 0x1d8   : > { %p566_p11 = pneg %p565_p10 }
 0x1da   : > { %673 = dma.done.wait (%p566_p11), %s441_s11, 512  }
 0x1db   : > { %675 = vsyncadd (%p566_p11), %s441_s11, 4294966784  ;;  %p16_p12 = scmp.ge.s32.totalorder %s752_s24, 6   ;;  %s897_s18 = smov %s682_s19 }
 0x1dc   : > { %s898_s19 = smov %s686_s20  ;;  %s899_s20 = smov %s763_s27 }
 0x1dd   : > { %s900_s21 = smov %s752_s24  ;;  %18 = sbr.rel (!%p16_p12) target bundleno = 4 (0x4), region = 80 }
 0x1e2   :  { %447 = vsyncpa [#allocation3], 1 }
 0x1e3   :  { %449 = vsyncpa [#allocation3 + $0x1], 1 }
 0x1e4   :  { %450 = vsyncpa [#allocation4], 1 }
 0x1e5   :  { %452 = vsyncpa [#allocation4 + $0x1], 1 }

</bundles_post_ra>
